<compile_context>
chip_gen: v6e
topology: v6e:2x2x1
jax: 0.10.0
libtpu: 0.0.40
codegen_flags: <defaults>
</compile_context>

<pallas_src>
import jax
import jax.numpy as jnp
from jax.experimental import pallas as pl
from jax.experimental.pallas import tpu as pltpu


def _lower_bound_kernel(bound_ref, x_ref, o_ref):
    # bound_ref: (1, 1) f32 scalar in SMEM; x_ref / o_ref: (block_rows, lanes) in VMEM.
    b = bound_ref[0, 0].astype(x_ref.dtype)
    o_ref[...] = jnp.maximum(x_ref[...], b)


_TARGET_BLOCK_BYTES = 4 * 1024 * 1024   # ~4 MiB/block -> 4x (dbl-buffered in+out) = 16 MiB VMEM
_VMEM_LIMIT_BYTES = 32 * 1024 * 1024    # explicit; safe on v5e/v6e (128 MiB) and v7x (64 MiB)
_LANE_CANDIDATES = (8192, 4096, 2048, 1024, 512, 256, 128)


def _round_up(a: int, b: int) -> int:
    return ((a + b - 1) // b) * b


def lower_bound_forward(x: jax.Array, bound: jax.Array) -> jax.Array:
    """Computes elementwise max(x, bound) (LowerBound forward).

    x: any-shape array (e.g. NCHW). bound: shape-(1,) scalar buffer (f32).
    """
    orig_shape = x.shape
    dtype = x.dtype
    n = x.size

    # Empty-input guard.
    if n == 0:
        return x

    itemsize = jnp.dtype(dtype).itemsize
    sublanes = max(8, 32 // itemsize)  # 8 for 4B dtypes, 16 for 2B, 32 for 1B

    # Ragged sizes: a fused XLA maximum does exactly one read + one write for
    # arbitrary shapes; the Pallas path would need pad + slice (2x traffic).
    if n % 128 != 0:
        b = jnp.asarray(bound, dtype=dtype).reshape(())
        return jnp.maximum(x, b)

    # Widest lane-dense last dim that divides n (reshape of a contiguous
    # tensor is free; no pad, no trailing slice).
    lanes = 128
    for w in _LANE_CANDIDATES:
        if n % w == 0:
            lanes = w
            break
    rows = n // lanes
    x2d = x.reshape(rows, lanes)

    if rows < 2 * sublanes:
        # Too small to split into two sublane-aligned blocks: one full-extent
        # block (legal even when rows isn't a multiple of the sublane count).
        block_rows = rows
        grid = (1,)
    else:
        # ~4 MiB blocks, but force an even block count >= 2 so both v7x
        # TensorCores get balanced work ("parallel" grid axis).
        budget_rows = max(sublanes, _TARGET_BLOCK_BYTES // (lanes * itemsize))
        nblocks = pl.cdiv(rows, min(budget_rows, rows))
        nblocks = max(2, nblocks)
        if nblocks % 2:
            nblocks += 1
        block_rows = _round_up(pl.cdiv(rows, nblocks), sublanes)
        grid = (pl.cdiv(rows, block_rows),)  # partial edge block handled by Pallas masking

    # Keep the bound as f32 in SMEM; cast to x's dtype inside the kernel.
    bound_smem = jnp.asarray(bound, dtype=jnp.float32).reshape(1, 1)

    out2d = pl.pallas_call(
        _lower_bound_kernel,
        out_shape=jax.ShapeDtypeStruct((rows, lanes), dtype),
        grid_spec=pl.GridSpec(
            grid=grid,
            in_specs=[
                pl.BlockSpec(memory_space=pltpu.SMEM),                # scalar bound
                pl.BlockSpec((block_rows, lanes), lambda i: (i, 0)),  # x tile
            ],
            out_specs=pl.BlockSpec((block_rows, lanes), lambda i: (i, 0)),
        ),
        compiler_params=pltpu.CompilerParams(
            dimension_semantics=("parallel",),
            vmem_limit_bytes=_VMEM_LIMIT_BYTES,
        ),
        cost_estimate=pl.CostEstimate(
            flops=n, transcendentals=0, bytes_accessed=2 * n * itemsize
        ),
    )(bound_smem, x2d)

    return out2d.reshape(orig_shape)


class LowerBoundJax:
    """JAX analogue of compressai LowerBound: holds the scalar bound buffer."""

    def __init__(self, bound: float, dtype=jnp.float32):
        # register_buffer('bound', torch.Tensor([float(bound)])) -> shape (1,)
        self.bound = jnp.array([float(bound)], dtype=dtype)

    def __call__(self, x: jax.Array) -> jax.Array:
        return lower_bound_forward(x, self.bound)


if __name__ == "__main__":
    key = jax.random.PRNGKey(0)
    module = LowerBoundJax(bound=0.11)  # deterministic bound, as in __init__

    # Small NCHW input consistent with typical usage (128-divisible -> Pallas path).
    x = jax.random.normal(key, (2, 4, 16, 16), dtype=jnp.float32)
    y = jax.block_until_ready(module(x))
    ref = jnp.maximum(x, module.bound[0])
    assert y.shape == x.shape and y.dtype == x.dtype
    assert jnp.allclose(y, ref), "mismatch vs reference (Pallas path)"

    # Ragged element count exercises the copy-free fallback path.
    x2 = jax.random.normal(jax.random.PRNGKey(1), (3, 5, 7), dtype=jnp.float32)
    y2 = jax.block_until_ready(module(x2))
    assert jnp.allclose(y2, jnp.maximum(x2, module.bound[0])), "mismatch vs reference (ragged path)"

    print("KERNEL_OK")
</pallas_src>

<mosaic_0001>
module attributes {stable_mosaic.version = 11 : i64} {
  func.func @_lower_bound_kernel(%arg0: i32, %arg1: memref<1x1xf32, #tpu.memory_space<smem>>, %arg2: memref<1x2048xf32, #tpu.memory_space<vmem>>, %arg3: memref<1x2048xf32, #tpu.memory_space<vmem>>) attributes {dimension_semantics = [#tpu.dimension_semantics<parallel>], iteration_bounds = array<i64: 1>, scalar_prefetch = 0 : i64, scratch_operands = 0 : i64, tpu.core_type = #tpu.core_type<tc>, window_params = [{transform_indices = @transform_0, window_bounds = array<i64: 1, 1>}, {transform_indices = @transform_1, window_bounds = array<i64: 1, 2048>}, {transform_indices = @transform_2, window_bounds = array<i64: 1, 2048>}]} {
    %c0 = arith.constant 0 : index
    %c0_0 = arith.constant 0 : index
    %0 = memref.load %arg1[%c0, %c0_0] : memref<1x1xf32, #tpu.memory_space<smem>>
    %c0_1 = arith.constant 0 : index
    %c0_2 = arith.constant 0 : index
    %1 = vector.load %arg2[%c0_1, %c0_2] : memref<1x2048xf32, #tpu.memory_space<vmem>>, vector<1x2048xf32>
    %2 = vector.broadcast %0 : f32 to vector<1x2048xf32>
    %3 = arith.maximumf %1, %2 : vector<1x2048xf32>
    %c0_3 = arith.constant 0 : index
    %c0_4 = arith.constant 0 : index
    %4 = vector.load %arg3[%c0_3, %c0_4] : memref<1x2048xf32, #tpu.memory_space<vmem>>, vector<1x2048xf32>
    tpu.vector_store %arg3[%c0_3, %c0_4], %3 {strides = array<i32>} : memref<1x2048xf32, #tpu.memory_space<vmem>>, vector<1x2048xf32>,
    return
  }
  func.func @transform_0(%arg0: i32) -> (i32, i32) {
    %c0_i32 = arith.constant 0 : i32
    %c0_i32_0 = arith.constant 0 : i32
    %c0_i32_1 = arith.constant 0 : i32
    return %c0_i32, %c0_i32_0 : i32, i32
  }
  func.func @transform_1(%arg0: i32) -> (i32, i32) {
    %c0_i32 = arith.constant 0 : i32
    %c0_i32_0 = arith.constant 0 : i32
    return %arg0, %c0_i32 : i32, i32
  }
  func.func @transform_2(%arg0: i32) -> (i32, i32) {
    %c0_i32 = arith.constant 0 : i32
    %c0_i32_0 = arith.constant 0 : i32
    return %arg0, %c0_i32 : i32, i32
  }
}

</mosaic_0001>

<bundles_post_ra>
// kernel: tpu_custom_call.1
= control target key start
LH: loop header
LB: loop body
LE: loop exit
PB: predicated region body
PF: predicated region fallthrough
CT: control target
= control target key end

     0   :  { %8 = vsyncpa [#allocation4], 0  ;;  %s120_s0 = inlined_call_operand.<no memory space> [shape: f32[1,1], index: 0, kind: input, shape index: {}]   ;;  %s121_s1 = inlined_call_operand.hbm [shape: f32[1,2048], index: 1, kind: input, shape index: {}]   ;;  %s122_s2 = inlined_call_operand.hbm [shape: f32[1,2048], index: 2, kind: output, shape index: {}]  }
   0x1   :  { %9 = vsyncpa [#allocation5], 0  ;;  %s94_s9 = smov [#allocation3]  }
   0x2   :  { %s18_s10 = sshll.u32 %s94_s9, 4  ;;  %s19_s10 = int_to_ptr.vmem [resolvable:$true] %s18_s10 }
   0x3   :  { %s58_s11 = scalar_lea.vmem %s19_s10, 256  ;;  %p63_p1 = scmp.lt.s32.totalorder %s19_s10, %s19_s10 }
   0x4   :  { %p59_p0 = scmp.ne.s32.totalorder %s19_s10, %s58_s11  ;;  %p64_p2 = scmp.lt.s32.totalorder %s58_s11, %s58_s11 }
   0x6   :  { %p65_p3 = por %p64_p2, %p63_p1 }
   0x8   :  { %p66_p4 = pnand %p65_p3, %p59_p0 }
   0xa   :  { %69 = shalt.err (!%p66_p4)
}
   0xb   :  { %21 = dma.hbm_to_vmem [thread:$0]  %s121_s1, 256, %s19_s10, [#allocation4]  }
   0xc   :  { %90 = dma.done.wait [#allocation4], 256  }
   0xd   :  { %91 = vsyncadd [#allocation4], 4294967040  ;;  %v28_v0 = vstv %s120_s0  ;;  %s95_s16 = smov [#allocation6]   ;;  %v26_v1 = vld [vmem:[#allocation3] sm:$0xff]  ;;  %v27_v2 = vld [vmem:[#allocation3 + $0x8] sm:$0xff] }
   0xe   :  { %s39_s17 = sshll.u32 %s95_s16, 4  ;;  %v29_v3 = vmax.f32 %v26_v1, %v28_v0  ;;  %v30_v4 = vmax.f32 %v27_v2, %v28_v0  ;;  %s40_s17 = int_to_ptr.vmem [resolvable:$true] %s39_s17 }
   0xf   :  { %s70_s18 = scalar_lea.vmem %s40_s17, 256  ;;  %p75_p6 = scmp.lt.s32.totalorder %s40_s17, %s40_s17 }
  0x10   :  { %31 = vst [vmem:[#allocation6] sm:$0xff] %v29_v3  ;;  %32 = vst [vmem:[#allocation6 + $0x8] sm:$0xff] %v30_v4  ;;  %p71_p5 = scmp.ne.s32.totalorder %s40_s17, %s70_s18  ;;  %p76_p7 = scmp.lt.s32.totalorder %s70_s18, %s70_s18 }
  0x12   :  { %p77_p8 = por %p76_p7, %p75_p6 }
  0x14   :  { %p78_p9 = pnand %p77_p8, %p71_p5 }
  0x16   :  { %81 = shalt.err (!%p78_p9)
}
  0x17   :  { %42 = dma.vmem_to_hbm [thread:$0]  %s40_s17, 256, %s122_s2, [#allocation5]  }
  0x18   :  { %92 = dma.done.wait [#allocation5], 256  }
  0x19   :  { %93 = vsyncadd [#allocation5], 4294967040 }
  0x1a   :  { %46 = vsyncpa [#allocation4], 1 }
  0x1b   :  { %47 = vsyncpa [#allocation5], 1 }

</bundles_post_ra>
